<compile_context>
chip_gen: v6e
topology: v6e:2x2x1
jax: 0.10.0
libtpu: 0.0.40
codegen_flags: <defaults>
</compile_context>

<pallas_src>
import jax
import jax.numpy as jnp
from jax import lax
from jax.experimental import pallas as pl
from jax.experimental.pallas import tpu as pltpu

C_MID = 8    # conv1 output channels (= conv_transpose input channels)
C_OUT = 16   # conv_transpose output channels
K = 3        # kernel size of both layers
K1 = 16      # padded stage-1 contraction (9 taps + 1 bias row + 6 zero rows)
K2 = 32      # stage-2 contraction (4 lane-shifts x 8 input channels)
NP = 4       # number of stride-2 output parity planes (py, px)

# Polyphase taps of ConvTranspose2d(k=3, s=2, p=1):
#   parity (py, px) -> list of (shift_index j, kh, kw)
# Shift index j enumerates (di, dj) = (0,0), (0,1), (1,0), (1,1); flat lane shift = di*W + dj.
# Semantics: out[oc, 2m+py, 2n+px] += v1[ic, m+di, n+dj] * wt[ic, oc, kh, kw].
_TAPS = {
    (0, 0): ((0, 1, 1),),
    (0, 1): ((1, 1, 0), (0, 1, 2)),
    (1, 0): ((2, 0, 1), (0, 2, 1)),
    (1, 1): ((3, 0, 0), (2, 0, 2), (1, 2, 0), (0, 2, 2)),
}


def _round_up(v, m):
    return (v + m - 1) // m * m


def _make_kernel(Lp, Lx, shifts):
    """shifts = (0, 1, W, W+1): flat-layout lane shifts of the four (di, dj) tap offsets."""

    def kernel(xcol_ref, w1_ref, w2_ref, o_ref, va):
        # ---- Stage 1: Conv2d(1 -> 8, k=3, valid) as one MXU matmul (bias folded into xcol).
        v1 = jnp.dot(w1_ref[...], xcol_ref[...],
                     preferred_element_type=jnp.float32)              # (8, Lp)
        va[0:C_MID, 0:Lp] = v1
        # Keep the shifted reads below in-bounds and finite (tail is never used downstream).
        va[0:C_MID, Lp:Lx] = jnp.zeros((C_MID, Lx - Lp), jnp.float32)

        # ---- Build the shifted copies: Vall[j*8 + ic, l] = v1[ic, l + shift_j].
        for j, s in enumerate(shifts):
            if j == 0:
                continue                                               # band 0 is v1 itself
            va[j * C_MID:(j + 1) * C_MID, 0:Lp] = va[0:C_MID, s:s + Lp]

        # ---- Stage 2: combined polyphase ConvTranspose + fused sigmoid on the MXU/EUP.
        # Four 16-row groups bound the live matmul result to (16, Lp) while costing the same
        # number of MXU pushes as a single (64, 32) @ (32, Lp) product.
        for g in range(NP):
            acc = jnp.dot(w2_ref[g * C_OUT:(g + 1) * C_OUT, :], va[:, 0:Lp],
                          preferred_element_type=jnp.float32)          # (16, Lp)
            o_ref[g * C_OUT:(g + 1) * C_OUT, :] = jax.nn.sigmoid(acc)  # full, lane-dense store

    return kernel


def _build_w2(wt):
    """Combined polyphase ConvTranspose weights (4*C_OUT, 4*C_MID):
    rows = p*16 + oc (p = py*2 + px), cols = j*8 + ic (j = lane-shift index)."""
    w2 = jnp.zeros((NP * C_OUT, NP * C_MID), jnp.float32)
    for (py, px), taps in _TAPS.items():
        p = py * 2 + px
        for (j, kh, kw) in taps:
            blk = wt[:, :, kh, kw].astype(jnp.float32).T               # (oc, ic)
            w2 = w2.at[p * C_OUT:(p + 1) * C_OUT, j * C_MID:(j + 1) * C_MID].set(blk)
    return w2


@jax.jit
def model_forward(x_nchw, w1, b1, wt):
    """x_nchw: (1, 1, H, W); w1: (8, 1, 3, 3) OIHW; b1: (8,); wt: (8, 16, 3, 3) ConvTranspose layout."""
    x = x_nchw[0, 0].astype(jnp.float32)       # spec module is batch 1 / 1 input channel
    H, W = x.shape
    Ho, Wo = H - (K - 1), W - (K - 1)
    Hout, Wout = 2 * Ho - 1, 2 * Wo - 1
    L = Ho * W                                  # flat plane length (row stride W; 2 junk cols/row)
    Lp = _round_up(L, 128)                      # lane-dense padded plane length
    Lx = Lp + _round_up(W + 2, 128)             # scratch width (room for the W+1 lane shift)

    # ---- Stage-1 im2col rows: contiguous slices of the flattened input (pure layout prep).
    xpad = jnp.pad(x.reshape(-1), (0, Lp - L + 2 * W + 2))
    rows = [xpad[kh * W + kw: kh * W + kw + Lp] for kh in range(K) for kw in range(K)]
    rows.append(jnp.ones((Lp,), jnp.float32))                           # bias row
    rows.extend([jnp.zeros((Lp,), jnp.float32)] * (K1 - K * K - 1))     # pad K to 16
    xcol = jnp.stack(rows, axis=0)                                      # (16, Lp)

    w1m = jnp.concatenate(
        [w1.reshape(C_MID, K * K).astype(jnp.float32),
         b1.reshape(C_MID, 1).astype(jnp.float32),
         jnp.zeros((C_MID, K1 - K * K - 1), jnp.float32)], axis=1)      # (8, 16)

    w2 = _build_w2(wt)                                                  # (64, 32)

    out64 = pl.pallas_call(
        _make_kernel(Lp, Lx, (0, 1, W, W + 1)),
        grid=(1,),
        in_specs=[
            pl.BlockSpec((K1, Lp), lambda i: (0, 0)),
            pl.BlockSpec((C_MID, K1), lambda i: (0, 0)),
            pl.BlockSpec((NP * C_OUT, NP * C_MID), lambda i: (0, 0)),
        ],
        out_specs=pl.BlockSpec((NP * C_OUT, Lp), lambda i: (0, 0)),
        out_shape=jax.ShapeDtypeStruct((NP * C_OUT, Lp), jnp.float32),
        scratch_shapes=[pltpu.VMEM((K2, Lx), jnp.float32)],
        compiler_params=pltpu.CompilerParams(dimension_semantics=("arbitrary",)),
    )(xcol, w1m, w2)

    # ---- Un-interleave the 4 stride-2 parity planes (single fused XLA transpose + slice):
    #   out64[p*16 + oc, m*W + n] -> out[oc, 2m+py, 2n+px],  p = py*2 + px.
    o = out64[:, :L].reshape(2, 2, C_OUT, Ho, W)
    full = jnp.transpose(o, (2, 3, 0, 4, 1)).reshape(C_OUT, 2 * Ho, 2 * W)
    return full[None, :, :Hout, :Wout]                                  # NCHW (1, 16, Hout, Wout)


def _reference(x_nchw, w1, b1, wt):
    """Pure-XLA reference (matches PyTorch semantics) for verification."""
    s, p, k = 2, 1, 3
    v1 = lax.conv_general_dilated(
        x_nchw, w1, window_strides=(1, 1), padding="VALID",
        dimension_numbers=("NCHW", "OIHW", "NCHW"),
        precision=lax.Precision.HIGHEST) + b1.reshape(1, -1, 1, 1)
    w_oihw = jnp.transpose(jnp.flip(wt, axis=(2, 3)), (1, 0, 2, 3))
    q = k - 1 - p
    v2 = lax.conv_general_dilated(
        v1, w_oihw, window_strides=(1, 1), padding=[(q, q), (q, q)],
        lhs_dilation=(s, s), dimension_numbers=("NCHW", "OIHW", "NCHW"),
        precision=lax.Precision.HIGHEST)
    return jax.nn.sigmoid(v2)


if __name__ == "__main__":
    key = jax.random.PRNGKey(0)
    k1, k2, k3, k4 = jax.random.split(key, 4)

    # Small spatial size consistent with the module (spec uses 128; 32 keeps the test light).
    H = W = 32
    x1 = jax.random.normal(k1, (1, 1, H, W), jnp.float32)

    # Deterministic parameter init (PyTorch-like uniform bounds).
    fan_in1 = 1 * K * K
    bound1 = 1.0 / (fan_in1 ** 0.5)
    w1 = jax.random.uniform(k2, (C_MID, 1, K, K), jnp.float32, -bound1, bound1)
    b1 = jax.random.uniform(k3, (C_MID,), jnp.float32, -bound1, bound1)

    fan_in2 = C_MID * K * K
    bound2 = 1.0 / (fan_in2 ** 0.5)
    wt = jax.random.uniform(k4, (C_MID, C_OUT, K, K), jnp.float32, -bound2, bound2)

    out = model_forward(x1, w1, b1, wt)
    out = jax.block_until_ready(out)

    expected = 2 * (H - 2) - 1                      # conv -> conv_transpose output size
    assert out.shape == (1, C_OUT, expected, expected), out.shape

    ref = _reference(x1, w1, b1, wt)
    max_err = float(jnp.max(jnp.abs(out - ref)))
    # 2e-3 gate: robust to the MXU's f32 (bf16-pass) matmul precision while still catching any
    # structural / tap-placement bug (those show up at >= 1e-2 on sigmoid outputs).
    assert max_err < 2e-3, max_err

    print("KERNEL_OK")
</pallas_src>

<mosaic_0001>
module attributes {stable_mosaic.version = 11 : i64} {
  func.func @kernel(%arg0: i32, %arg1: memref<16x1024xf32, #tpu.memory_space<vmem>>, %arg2: memref<8x16xf32, #tpu.memory_space<vmem>>, %arg3: memref<64x32xf32, #tpu.memory_space<vmem>>, %arg4: memref<64x1024xf32, #tpu.memory_space<vmem>>, %arg5: memref<32x1152xf32, #tpu.memory_space<vmem>>) attributes {dimension_semantics = [#tpu.dimension_semantics<arbitrary>], iteration_bounds = array<i64: 1>, scalar_prefetch = 0 : i64, scratch_operands = 1 : i64, tpu.core_type = #tpu.core_type<tc>, window_params = [{pipeline_mode = #tpu.pipeline_mode<synchronous>, transform_indices = @transform_0, window_bounds = array<i64: 16, 1024>}, {pipeline_mode = #tpu.pipeline_mode<synchronous>, transform_indices = @transform_1, window_bounds = array<i64: 8, 16>}, {pipeline_mode = #tpu.pipeline_mode<synchronous>, transform_indices = @transform_2, window_bounds = array<i64: 64, 32>}, {pipeline_mode = #tpu.pipeline_mode<synchronous>, transform_indices = @transform_3, window_bounds = array<i64: 64, 1024>}]} {
    %c0 = arith.constant 0 : index
    %c0_0 = arith.constant 0 : index
    %0 = vector.load %arg2[%c0, %c0_0] : memref<8x16xf32, #tpu.memory_space<vmem>>, vector<8x16xf32>
    %c0_1 = arith.constant 0 : index
    %c0_2 = arith.constant 0 : index
    %1 = vector.load %arg1[%c0_1, %c0_2] : memref<16x1024xf32, #tpu.memory_space<vmem>>, vector<16x1024xf32>
    %cst = arith.constant dense<0.000000e+00> : vector<8x1024xf32>
    %2 = tpu.matmul %0, %1, %cst {dimension_numbers = #tpu.dot_dimension_numbers<[1], [0], [0], [1], [0, 0, 1, 1], [], []>} : vector<8x16xf32>, vector<16x1024xf32>, vector<8x1024xf32> -> vector<8x1024xf32>
    %c0_3 = arith.constant 0 : index
    %c0_4 = arith.constant 0 : index
    %3 = vector.load %arg5[%c0_3, %c0_4] : memref<32x1152xf32, #tpu.memory_space<vmem>>, vector<8x1024xf32>
    tpu.vector_store %arg5[%c0_3, %c0_4], %2 {strides = array<i32>} : memref<32x1152xf32, #tpu.memory_space<vmem>>, vector<8x1024xf32>,
    %cst_5 = arith.constant 0.000000e+00 : f32
    %4 = vector.broadcast %cst_5 : f32 to vector<8x128xf32>
    %c0_6 = arith.constant 0 : index
    %c1024 = arith.constant 1024 : index
    %5 = vector.load %arg5[%c0_6, %c1024] : memref<32x1152xf32, #tpu.memory_space<vmem>>, vector<8x128xf32>
    tpu.vector_store %arg5[%c0_6, %c1024], %4 {strides = array<i32>} : memref<32x1152xf32, #tpu.memory_space<vmem>>, vector<8x128xf32>,
    %c0_7 = arith.constant 0 : index
    %c1 = arith.constant 1 : index
    %6 = vector.load %arg5[%c0_7, %c1] : memref<32x1152xf32, #tpu.memory_space<vmem>>, vector<8x1024xf32>
    %c8 = arith.constant 8 : index
    %c0_8 = arith.constant 0 : index
    %7 = vector.load %arg5[%c8, %c0_8] : memref<32x1152xf32, #tpu.memory_space<vmem>>, vector<8x1024xf32>
    tpu.vector_store %arg5[%c8, %c0_8], %6 {strides = array<i32>} : memref<32x1152xf32, #tpu.memory_space<vmem>>, vector<8x1024xf32>,
    %c0_9 = arith.constant 0 : index
    %c32 = arith.constant 32 : index
    %8 = vector.load %arg5[%c0_9, %c32] : memref<32x1152xf32, #tpu.memory_space<vmem>>, vector<8x1024xf32>
    %c16 = arith.constant 16 : index
    %c0_10 = arith.constant 0 : index
    %9 = vector.load %arg5[%c16, %c0_10] : memref<32x1152xf32, #tpu.memory_space<vmem>>, vector<8x1024xf32>
    tpu.vector_store %arg5[%c16, %c0_10], %8 {strides = array<i32>} : memref<32x1152xf32, #tpu.memory_space<vmem>>, vector<8x1024xf32>,
    %c0_11 = arith.constant 0 : index
    %c33 = arith.constant 33 : index
    %10 = vector.load %arg5[%c0_11, %c33] : memref<32x1152xf32, #tpu.memory_space<vmem>>, vector<8x1024xf32>
    %c24 = arith.constant 24 : index
    %c0_12 = arith.constant 0 : index
    %11 = vector.load %arg5[%c24, %c0_12] : memref<32x1152xf32, #tpu.memory_space<vmem>>, vector<8x1024xf32>
    tpu.vector_store %arg5[%c24, %c0_12], %10 {strides = array<i32>} : memref<32x1152xf32, #tpu.memory_space<vmem>>, vector<8x1024xf32>,
    %c0_13 = arith.constant 0 : index
    %c0_14 = arith.constant 0 : index
    %12 = vector.load %arg3[%c0_13, %c0_14] : memref<64x32xf32, #tpu.memory_space<vmem>>, vector<16x32xf32>
    %c0_15 = arith.constant 0 : index
    %c0_16 = arith.constant 0 : index
    %13 = vector.load %arg5[%c0_15, %c0_16] : memref<32x1152xf32, #tpu.memory_space<vmem>>, vector<32x1024xf32>
    %cst_17 = arith.constant dense<0.000000e+00> : vector<16x1024xf32>
    %14 = tpu.matmul %12, %13, %cst_17 {dimension_numbers = #tpu.dot_dimension_numbers<[1], [0], [0], [1], [0, 0, 1, 1], [], []>} : vector<16x32xf32>, vector<32x1024xf32>, vector<16x1024xf32> -> vector<16x1024xf32>
    %15 = arith.negf %14 : vector<16x1024xf32>
    %16 = math.exp %15 : vector<16x1024xf32>
    %cst_18 = arith.constant 1.000000e+00 : f32
    %17 = vector.broadcast %cst_18 : f32 to vector<16x1024xf32>
    %18 = arith.addf %17, %16 : vector<16x1024xf32>
    %19 = arith.divf %17, %18 : vector<16x1024xf32>
    %c0_19 = arith.constant 0 : index
    %c0_20 = arith.constant 0 : index
    %20 = vector.load %arg4[%c0_19, %c0_20] : memref<64x1024xf32, #tpu.memory_space<vmem>>, vector<16x1024xf32>
    tpu.vector_store %arg4[%c0_19, %c0_20], %19 {strides = array<i32>} : memref<64x1024xf32, #tpu.memory_space<vmem>>, vector<16x1024xf32>,
    %c16_21 = arith.constant 16 : index
    %c0_22 = arith.constant 0 : index
    %21 = vector.load %arg3[%c16_21, %c0_22] : memref<64x32xf32, #tpu.memory_space<vmem>>, vector<16x32xf32>
    %c0_23 = arith.constant 0 : index
    %c0_24 = arith.constant 0 : index
    %22 = vector.load %arg5[%c0_23, %c0_24] : memref<32x1152xf32, #tpu.memory_space<vmem>>, vector<32x1024xf32>
    %cst_25 = arith.constant dense<0.000000e+00> : vector<16x1024xf32>
    %23 = tpu.matmul %21, %22, %cst_25 {dimension_numbers = #tpu.dot_dimension_numbers<[1], [0], [0], [1], [0, 0, 1, 1], [], []>} : vector<16x32xf32>, vector<32x1024xf32>, vector<16x1024xf32> -> vector<16x1024xf32>
    %24 = arith.negf %23 : vector<16x1024xf32>
    %25 = math.exp %24 : vector<16x1024xf32>
    %cst_26 = arith.constant 1.000000e+00 : f32
    %26 = vector.broadcast %cst_26 : f32 to vector<16x1024xf32>
    %27 = arith.addf %26, %25 : vector<16x1024xf32>
    %28 = arith.divf %26, %27 : vector<16x1024xf32>
    %c16_27 = arith.constant 16 : index
    %c0_28 = arith.constant 0 : index
    %29 = vector.load %arg4[%c16_27, %c0_28] : memref<64x1024xf32, #tpu.memory_space<vmem>>, vector<16x1024xf32>
    tpu.vector_store %arg4[%c16_27, %c0_28], %28 {strides = array<i32>} : memref<64x1024xf32, #tpu.memory_space<vmem>>, vector<16x1024xf32>,
    %c32_29 = arith.constant 32 : index
    %c0_30 = arith.constant 0 : index
    %30 = vector.load %arg3[%c32_29, %c0_30] : memref<64x32xf32, #tpu.memory_space<vmem>>, vector<16x32xf32>
    %c0_31 = arith.constant 0 : index
    %c0_32 = arith.constant 0 : index
    %31 = vector.load %arg5[%c0_31, %c0_32] : memref<32x1152xf32, #tpu.memory_space<vmem>>, vector<32x1024xf32>
    %cst_33 = arith.constant dense<0.000000e+00> : vector<16x1024xf32>
    %32 = tpu.matmul %30, %31, %cst_33 {dimension_numbers = #tpu.dot_dimension_numbers<[1], [0], [0], [1], [0, 0, 1, 1], [], []>} : vector<16x32xf32>, vector<32x1024xf32>, vector<16x1024xf32> -> vector<16x1024xf32>
    %33 = arith.negf %32 : vector<16x1024xf32>
    %34 = math.exp %33 : vector<16x1024xf32>
    %cst_34 = arith.constant 1.000000e+00 : f32
    %35 = vector.broadcast %cst_34 : f32 to vector<16x1024xf32>
    %36 = arith.addf %35, %34 : vector<16x1024xf32>
    %37 = arith.divf %35, %36 : vector<16x1024xf32>
    %c32_35 = arith.constant 32 : index
    %c0_36 = arith.constant 0 : index
    %38 = vector.load %arg4[%c32_35, %c0_36] : memref<64x1024xf32, #tpu.memory_space<vmem>>, vector<16x1024xf32>
    tpu.vector_store %arg4[%c32_35, %c0_36], %37 {strides = array<i32>} : memref<64x1024xf32, #tpu.memory_space<vmem>>, vector<16x1024xf32>,
    %c48 = arith.constant 48 : index
    %c0_37 = arith.constant 0 : index
    %39 = vector.load %arg3[%c48, %c0_37] : memref<64x32xf32, #tpu.memory_space<vmem>>, vector<16x32xf32>
    %c0_38 = arith.constant 0 : index
    %c0_39 = arith.constant 0 : index
    %40 = vector.load %arg5[%c0_38, %c0_39] : memref<32x1152xf32, #tpu.memory_space<vmem>>, vector<32x1024xf32>
    %cst_40 = arith.constant dense<0.000000e+00> : vector<16x1024xf32>
    %41 = tpu.matmul %39, %40, %cst_40 {dimension_numbers = #tpu.dot_dimension_numbers<[1], [0], [0], [1], [0, 0, 1, 1], [], []>} : vector<16x32xf32>, vector<32x1024xf32>, vector<16x1024xf32> -> vector<16x1024xf32>
    %42 = arith.negf %41 : vector<16x1024xf32>
    %43 = math.exp %42 : vector<16x1024xf32>
    %cst_41 = arith.constant 1.000000e+00 : f32
    %44 = vector.broadcast %cst_41 : f32 to vector<16x1024xf32>
    %45 = arith.addf %44, %43 : vector<16x1024xf32>
    %46 = arith.divf %44, %45 : vector<16x1024xf32>
    %c48_42 = arith.constant 48 : index
    %c0_43 = arith.constant 0 : index
    %47 = vector.load %arg4[%c48_42, %c0_43] : memref<64x1024xf32, #tpu.memory_space<vmem>>, vector<16x1024xf32>
    tpu.vector_store %arg4[%c48_42, %c0_43], %46 {strides = array<i32>} : memref<64x1024xf32, #tpu.memory_space<vmem>>, vector<16x1024xf32>,
    return
  }
  func.func @transform_0(%arg0: i32) -> (i32, i32) {
    %c0_i32 = arith.constant 0 : i32
    %c0_i32_0 = arith.constant 0 : i32
    %c0_i32_1 = arith.constant 0 : i32
    return %c0_i32, %c0_i32_0 : i32, i32
  }
  func.func @transform_1(%arg0: i32) -> (i32, i32) {
    %c0_i32 = arith.constant 0 : i32
    %c0_i32_0 = arith.constant 0 : i32
    %c0_i32_1 = arith.constant 0 : i32
    return %c0_i32, %c0_i32_0 : i32, i32
  }
  func.func @transform_2(%arg0: i32) -> (i32, i32) {
    %c0_i32 = arith.constant 0 : i32
    %c0_i32_0 = arith.constant 0 : i32
    %c0_i32_1 = arith.constant 0 : i32
    return %c0_i32, %c0_i32_0 : i32, i32
  }
  func.func @transform_3(%arg0: i32) -> (i32, i32) {
    %c0_i32 = arith.constant 0 : i32
    %c0_i32_0 = arith.constant 0 : i32
    %c0_i32_1 = arith.constant 0 : i32
    return %c0_i32, %c0_i32_0 : i32, i32
  }
}

</mosaic_0001>

<bundles_post_ra>
// kernel: squeeze.10
= control target key start
LH: loop header
LB: loop body
LE: loop exit
PB: predicated region body
PF: predicated region fallthrough
CT: control target
= control target key end

     0   :  { %2 = vsyncpa [#allocation1], 0  ;;  %s60_s6 = smov [#allocation0]   ;;  %s89_s0 = inlined_call_operand.hbm [shape: f32[1,1,32,32], index: 0, kind: input, shape index: {}]   ;;  %s90_s1 = inlined_call_operand.vmem [shape: f32[1024], index: 1, kind: output, shape index: {}]  }
   0x1   :  { %s7_s7 = sshll.u32 %s60_s6, 4  ;;  %s8_s7 = int_to_ptr.vmem [resolvable:$true] %s7_s7 }
   0x2   :  { %s46_s8 = scalar_lea.vmem %s8_s7, 512  ;;  %p51_p1 = scmp.lt.s32.totalorder %s8_s7, %s8_s7 }
   0x3   :  { %p47_p0 = scmp.ne.s32.totalorder %s8_s7, %s46_s8  ;;  %p52_p2 = scmp.lt.s32.totalorder %s46_s8, %s46_s8 }
   0x5   :  { %p53_p3 = por %p52_p2, %p51_p1 }
   0x7   :  { %p54_p4 = pnand %p53_p3, %p47_p0 }
   0x9   :  { %57 = shalt.err (!%p54_p4)
}
   0xa   :  { %10 = dma.hbm_to_vmem [thread:$0]  %s89_s0, 512, %s8_s7, [#allocation1]  }
   0xb   :  { %58 = dma.done.wait [#allocation1], 512  }
   0xc   :  { %59 = vsyncadd [#allocation1], 4294966784  ;;  %vm13_vm0 = vcmask 261120   ;;  %v16_v0 = vld [vmem:[#allocation0 + $0x3] ss:$4 sm:$0xff]   ;;  %s61_s0 = smov 96  }
   0xd   :  { %v28_v1 = vld [vmem:[#allocation0 + $0x1] ss:$4 sm:$0xff]   ;;  %17 = vrot.lane.b32.xlu0 %v16_v0, %s61_s0  ;;  %s62_s11 = smov 32   ;;  %v12_v2 = vld [vmem:[#allocation0] ss:$4 sm:$0xff]   ;;  %s63_s14 = smov 64  }
   0xe   :  { %29 = vrot.lane.b32.xlu1 %v28_v1, %s62_s11  ;;  %v22_v3 = vld [vmem:[#allocation0 + $0x2] ss:$4 sm:$0xff]   ;;  %14 = vst.msk [vmem:[%s90_s1] sm:$0xff] %vm13_vm0, %v12_v2   ;;  %vm19_vm1 = vcmask 1048320   ;;  %vm25_vm2 = vcmask 785920   ;;  %vm31_vm3 = vcmask 523520  }
  0x11   :  { %23 = vrot.lane.b32.xlu0 %v22_v3, %s63_s14 }
  0x7f   :  { %v18_v4 = vpop.permute.xlu0 %17  }
  0x80   :  { %v30_v5 = vpop.permute.xlu1 %29   ;;  %20 = vst.msk [vmem:[%s90_s1] sm:$0xff] %vm19_vm1, %v18_v4  }
  0x83   :  { %v24_v6 = vpop.permute.xlu0 %23  }
  0x84   :  { %26 = vst.msk [vmem:[%s90_s1] sm:$0xff] %vm25_vm2, %v24_v6  }
  0x85   :  { %32 = vst.msk [vmem:[%s90_s1] sm:$0xff] %vm31_vm3, %v30_v5  }
  0x86   :  { %33 = vsyncpa [#allocation1], 1 }

// kernel: model_forward.1
= control target key start
LH: loop header
LB: loop body
LE: loop exit
PB: predicated region body
PF: predicated region fallthrough
CT: control target
= control target key end

     0   :  { %v2716_v3 = vmov 0.0   ;;  %vm31_vm0 = vcmask 130048   ;;  %s2717_s18 = smov 95   ;;  %s2719_s19 = smov 127   ;;  %vm486_vm1 = vcmask 777216   ;;  %vm425_vm2 = vcmask 785408   ;;  %s3355_s0 = inlined_call_operand.vmem [shape: f32[16,1024], index: 0, kind: input, shape index: {}]   ;;  %s3356_s1 = inlined_call_operand.vmem [shape: f32[8,16], index: 1, kind: input, shape index: {}]   ;;  %s3357_s2 = inlined_call_operand.vmem [shape: f32[64,32], index: 2, kind: input, shape index: {}]   ;;  %s3358_s3 = inlined_call_operand.vmem [shape: f32[64,1024], index: 3, kind: output, shape index: {}]  }
   0x1   :  { %v24_v0 = vld [vmem:[%s3355_s0 + $0x48] sm:$0xff]  ;;  %v26_v1 = vld [vmem:[%s3355_s0 + $0x58] sm:$0xff]  ;;  %v23_v2 = vld [vmem:[%s3355_s0 + $0x40] sm:$0xff]  ;;  %99 = vmatprep.mubr.f32.mxu0 %v2716_v3  ;;  %170 = vmatprep.mubr.f32.mxu1 %v2716_v3  ;;  %vm364_vm3 = vcmask 1039360   ;;  %vm545_vm4 = vcmask 261120  }
   0x2   :  { %63 = vmatprep.subr.mxu0 %v24_v0  ;;  %134 = vmatprep.subr.mxu1 %v26_v1  ;;  %v25_v4 = vld [vmem:[%s3355_s0 + $0x50] sm:$0xff]  ;;  %v16_v5 = vld [vmem:[%s3355_s0 + $0x8] sm:$0xff]  ;;  %v18_v6 = vld [vmem:[%s3355_s0 + $0x18] sm:$0xff] }
   0x3   :  { %64 = vmatpush1.msra.mxu0 %v23_v2  ;;  %135 = vmatpush1.msra.mxu1 %v25_v4  ;;  %v15_v7 = vld [vmem:[%s3355_s0] sm:$0xff]  ;;  %v17_v8 = vld [vmem:[%s3355_s0 + $0x10] sm:$0xff]  ;;  %v28_v10 = vld [vmem:[%s3355_s0 + $0x68] sm:$0xff] }
   0x4   :  { %v14_v9 = vld [vmem:[%s3356_s1] sm:$0xff]  ;;  %65 = vmatprep.subr.mxu0 %v16_v5  ;;  %136 = vmatprep.subr.mxu1 %v18_v6  ;;  %v30_v12 = vld [vmem:[%s3355_s0 + $0x78] sm:$0xff]  ;;  %v20_v13 = vld [vmem:[%s3355_s0 + $0x28] sm:$0xff] }
   0x5   :  { %66 = vmatpush1.msra.mxu0 %v15_v7  ;;  %137 = vmatpush1.msra.mxu1 %v17_v8  ;;  %v27_v11 = vld [vmem:[%s3355_s0 + $0x60] sm:$0xff]  ;;  %v29_v14 = vld [vmem:[%s3355_s0 + $0x70] sm:$0xff]  ;;  %v22_v16 = vld [vmem:[%s3355_s0 + $0x38] sm:$0xff] }
   0x6   :  { %2356 = vmatmul.mubr.msk.f32.vlgmr.msra.gmra.mxu0 %vm31_vm0, %v14_v9  ;;  %2357 = vmatmul.mubr.msk.f32.vlgmr.msra.gmra.mxu1 %vm31_vm0, %v14_v9  ;;  %v19_v15 = vld [vmem:[%s3355_s0 + $0x20] sm:$0xff]  ;;  %v21_v17 = vld [vmem:[%s3355_s0 + $0x30] sm:$0xff]  ;;  %s2718_s0 = smov 96   ;;  %v2909_v51 = vld [vmem:[%s3357_s2 + $0x8] sm:$0xff] }
   0x7   :  { %205 = vmatprep.subr.mxu0 %v28_v10  ;;  %241 = vmatprep.mubr.f32.mxu0 %v2716_v3  ;;  %v2899_v48 = vld [vmem:[%s3357_s2] sm:$0xff] }
   0x8   :  { %206 = vmatpush1.msra.mxu0 %v27_v11  ;;  %276 = vmatprep.subr.mxu1 %v30_v12 }
   0x9   :  { %207 = vmatprep.subr.mxu0 %v20_v13  ;;  %277 = vmatpush1.msra.mxu1 %v29_v14 }
   0xa   :  { %208 = vmatpush1.msra.mxu0 %v19_v15  ;;  %278 = vmatprep.subr.mxu1 %v22_v16  ;;  %v972_v16 = vld [vmem:[%s3357_s2 + $0x10] sm:$0xff] }
   0xb   :  { %2358 = vmatmul.mubr.msk.f32.vlgmr.msra.gmra.mxu0 %vm31_vm0, %v14_v9  ;;  %279 = vmatpush1.msra.mxu1 %v21_v17  ;;  %v973_v17 = vld [vmem:[%s3357_s2 + $0x18] sm:$0xff] }
   0xc   :  { %312 = vmatprep.mubr.f32.mxu1 %v2716_v3  ;;  %484 = vrot.lane.b32.xlu0 %v2716_v3, %s2717_s18 }
   0xd   :  { %2359 = vmatmul.mubr.msk.f32.vlgmr.msra.gmra.mxu1 %vm31_vm0, %v14_v9  ;;  %616 = vmatprep.mubr.f32.mxu0 %v2716_v3 }
   0xe   :  { %693 = vmatprep.mubr.f32.mxu1 %v2716_v3 }
  0x10   :  { %423 = vrot.lane.b32.xlu0 %v2716_v3, %s2718_s0 }
  0x7e   :  { %v485_v26 = vpop.permute.xlu0 %484 }
  0x82   :  { %v2862_v27 = vpop.permute.xlu0 %423 }
  0xc6   :  { %v2805_v18 = vpop.f32.mrf.mxu0  ;;  %v2807_v19 = vpop.f32.mrf.mxu1 }
  0xc7   :  { %472 = vrot.lane.b32.xlu0 %v2807_v19, %s2717_s18  ;;  %407 = vrot.lane.b32.xlu1 %v2805_v18, %s2718_s0 }
  0xc8   :  { %v2816_v20 = vpop.f32.mrf.mxu1  ;;  %v2822_v21 = vpop.f32.mrf.mxu0 }
  0xcb   :  { %350 = vrot.lane.b32.xlu1 %v2807_v19, %s2719_s19  ;;  %468 = vrot.lane.b32.xlu0 %v2805_v18, %s2717_s18  ;;  %v2831_v22 = vpop.f32.mrf.mxu0 }
  0xcd   :  { %v2838_v23 = vpop.f32.mrf.mxu0  ;;  %v2840_v24 = vpop.f32.mrf.mxu1 }
  0xcf   :  { %474 = vrot.lane.b32.xlu1 %v2816_v20, %s2717_s18  ;;  %411 = vrot.lane.b32.xlu0 %v2807_v19, %s2718_s0  ;;  %v2846_v25 = vpop.f32.mrf.mxu1 }
  0xd3   :  { %346 = vrot.lane.b32.xlu0 %v2805_v18, %s2719_s19  ;;  %409 = vrot.lane.b32.xlu1 %v2822_v21, %s2718_s0 }
  0xd7   :  { %413 = vrot.lane.b32.xlu1 %v2816_v20, %s2718_s0  ;;  %470 = vrot.lane.b32.xlu0 %v2822_v21, %s2717_s18 }
  0xdb   :  { %348 = vrot.lane.b32.xlu0 %v2822_v21, %s2719_s19  ;;  %476 = vrot.lane.b32.xlu1 %v2831_v22, %s2717_s18 }
  0xdf   :  { %352 = vrot.lane.b32.xlu0 %v2816_v20, %s2719_s19  ;;  %354 = vrot.lane.b32.xlu1 %v2831_v22, %s2719_s19 }
  0xe3   :  { %415 = vrot.lane.b32.xlu0 %v2831_v22, %s2718_s0  ;;  %478 = vrot.lane.b32.xlu1 %v2838_v23, %s2717_s18 }
  0xe7   :  { %480 = vrot.lane.b32.xlu0 %v2840_v24, %s2717_s18  ;;  %482 = vrot.lane.b32.xlu1 %v2846_v25, %s2717_s18 }
  0xeb   :  { %419 = vrot.lane.b32.xlu0 %v2840_v24, %s2718_s0  ;;  %417 = vrot.lane.b32.xlu1 %v2838_v23, %s2718_s0 }
  0xef   :  { %358 = vrot.lane.b32.xlu0 %v2840_v24, %s2719_s19  ;;  %421 = vrot.lane.b32.xlu1 %v2846_v25, %s2718_s0 }
  0xf3   :  { %356 = vrot.lane.b32.xlu1 %v2838_v23, %s2719_s19  ;;  %362 = vrot.lane.b32.xlu0 %v2716_v3, %s2719_s19 }
  0xf7   :  { %360 = vrot.lane.b32.xlu1 %v2846_v25, %s2719_s19 }
 0x139   :  { %v473_v28 = vpop.permute.xlu0 %472  ;;  %v408_v29 = vpop.permute.xlu1 %407 }
 0x13d   :  { %v351_v30 = vpop.permute.xlu1 %350  ;;  %v469_v31 = vpop.permute.xlu0 %468 }
 0x141   :  { %v475_v32 = vpop.permute.xlu1 %474  ;;  %v412_v33 = vpop.permute.xlu0 %411 }
 0x142   :  { %v2890_v47 = vsel %vm486_vm1, %v473_v28, %v475_v32 }
 0x145   :  { %v347_v34 = vpop.permute.xlu0 %346  ;;  %v410_v35 = vpop.permute.xlu1 %409 }
 0x146   :  { %v2872_v40 = vsel %vm425_vm2, %v410_v35, %v412_v33  ;;  %v2876_v41 = vsel %vm425_vm2, %v408_v29, %v410_v35 }
 0x149   :  { %v414_v36 = vpop.permute.xlu1 %413  ;;  %v471_v37 = vpop.permute.xlu0 %470 }
 0x14a   :  { %v2865_v38 = vsel %vm486_vm1, %v469_v31, %v471_v37  ;;  %v2868_v39 = vsel %vm486_vm1, %v471_v37, %v473_v28  ;;  %v2915_v55 = vsel %vm425_vm2, %v412_v33, %v414_v36  ;;  %v1892_v28 = vld [vmem:[%s3357_s2 + $0x30] sm:$0xff] }
 0x14b   :  { %576 = vmatprep.subr.mxu0 %v2868_v39 }
 0x14c   :  { %577 = vmatpush1.msra.mxu0 %v2865_v38 }
 0x14d   :  { %578 = vmatprep.subr.mxu0 %v2872_v40  ;;  %v349_v42 = vpop.permute.xlu0 %348  ;;  %v477_v43 = vpop.permute.xlu1 %476 }
 0x14e   :  { %v2880_v44 = vsel %vm364_vm3, %v347_v34, %v349_v42  ;;  %v2883_v45 = vsel %vm364_vm3, %v349_v42, %v351_v30  ;;  %v2886_v46 = vsel %vm486_vm1, %v475_v32, %v477_v43  ;;  %579 = vmatpush1.msra.mxu0 %v2876_v41 }
 0x14f   :  { %580 = vmatprep.subr.mxu0 %v2883_v45  ;;  %653 = vmatprep.subr.mxu1 %v2886_v46 }
 0x150   :  { %581 = vmatpush1.msra.mxu0 %v2880_v44  ;;  %654 = vmatpush1.msra.mxu1 %v2890_v47 }
 0x151   :  { %582 = vmatprep.subr.mxu0 %v2822_v21  ;;  %v353_v49 = vpop.permute.xlu0 %352  ;;  %v355_v50 = vpop.permute.xlu1 %354 }
 0x152   :  { %583 = vmatpush1.msra.mxu0 %v2805_v18  ;;  %v2921_v56 = vsel %vm364_vm3, %v353_v49, %v355_v50  ;;  %v2926_v57 = vsel %vm364_vm3, %v351_v30, %v353_v49 }
 0x153   :  { %2360 = vmatmul.mubr.msk.f32.vlgmr.msra.gmra.mxu0 %vm545_vm4, %v2899_v48 }
 0x154   :  { %622 = vmatprep.mubr.f32.mxu0 %v2716_v3 }
 0x155   :  { %v416_v52 = vpop.permute.xlu0 %415  ;;  %v479_v53 = vpop.permute.xlu1 %478 }
 0x156   :  { %v2912_v54 = vsel %vm425_vm2, %v414_v36, %v416_v52  ;;  %v2934_v61 = vsel %vm486_vm1, %v477_v43, %v479_v53 }
 0x157   :  { %655 = vmatprep.subr.mxu1 %v2912_v54  ;;  %2361 = vmatmul.mubr.msk.f32.gmra.mxu0 %vm545_vm4, %v2909_v51 }
 0x158   :  { %656 = vmatpush1.msra.mxu1 %v2915_v55  ;;  %770 = vmatprep.mubr.f32.mxu0 %v2716_v3 }
 0x159   :  { %v481_v58 = vpop.permute.xlu0 %480  ;;  %657 = vmatprep.subr.mxu1 %v2921_v56  ;;  %v483_v59 = vpop.permute.xlu1 %482 }
 0x15a   :  { %v2930_v60 = vsel %vm486_vm1, %v479_v53, %v481_v58  ;;  %658 = vmatpush1.msra.mxu1 %v2926_v57  ;;  %v2939_v62 = vsel %vm486_vm1, %v483_v59, %v485_v26  ;;  %v2944_v63 = vsel %vm486_vm1, %v481_v58, %v483_v59  ;;  %v1432_v26 = vld [vmem:[%s3357_s2 + $0x20] sm:$0xff] }
 0x15b   :  { %659 = vmatprep.subr.mxu1 %v2816_v20  ;;  %730 = vmatprep.subr.mxu0 %v2930_v60 }
 0x15c   :  { %660 = vmatpush1.msra.mxu1 %v2807_v19  ;;  %731 = vmatpush1.msra.mxu0 %v2934_v61 }
 0x15d   :  { %v420_v0 = vpop.permute.xlu0 %419  ;;  %807 = vmatprep.subr.mxu1 %v2939_v62  ;;  %v418_v1 = vpop.permute.xlu1 %417  ;;  %2362 = vmatmul.mubr.msk.f32.vlgmr.msra.gmra.mxu1 %vm545_vm4, %v2899_v48 }
 0x15e   :  { %v2950_v2 = vsel %vm425_vm2, %v416_v52, %v418_v1  ;;  %v2953_v4 = vsel %vm425_vm2, %v418_v1, %v420_v0  ;;  %808 = vmatpush1.msra.mxu1 %v2944_v63  ;;  %699 = vmatprep.mubr.f32.mxu1 %v2716_v3 }
 0x15f   :  { %732 = vmatprep.subr.mxu0 %v2953_v4 }
 0x160   :  { %733 = vmatpush1.msra.mxu0 %v2950_v2 }
 0x161   :  { %v422_v5 = vpop.permute.xlu1 %421  ;;  %2363 = vmatmul.mubr.msk.f32.gmra.mxu1 %vm545_vm4, %v2909_v51  ;;  %v359_v8 = vpop.permute.xlu0 %358 }
 0x162   :  { %v2962_v6 = vsel %vm425_vm2, %v420_v0, %v422_v5  ;;  %v2966_v7 = vsel %vm425_vm2, %v422_v5, %v2862_v27  ;;  %847 = vmatprep.mubr.f32.mxu1 %v2716_v3  ;;  %v1433_v27 = vld [vmem:[%s3357_s2 + $0x28] sm:$0xff] }
 0x163   :  { %809 = vmatprep.subr.mxu1 %v2966_v7 }
 0x164   :  { %810 = vmatpush1.msra.mxu1 %v2962_v6 }
 0x165   :  { %v357_v9 = vpop.permute.xlu1 %356  ;;  %v363_v12 = vpop.permute.xlu0 %362 }
 0x166   :  { %v2972_v10 = vsel %vm364_vm3, %v355_v50, %v357_v9  ;;  %v2975_v11 = vsel %vm364_vm3, %v357_v9, %v359_v8 }
 0x167   :  { %734 = vmatprep.subr.mxu0 %v2975_v11 }
 0x168   :  { %735 = vmatpush1.msra.mxu0 %v2972_v10 }
 0x169   :  { %736 = vmatprep.subr.mxu0 %v2838_v23  ;;  %v361_v13 = vpop.permute.xlu1 %360 }
 0x16a   :  { %v2981_v14 = vsel %vm364_vm3, %v359_v8, %v361_v13  ;;  %v2984_v15 = vsel %vm364_vm3, %v361_v13, %v363_v12  ;;  %737 = vmatpush1.msra.mxu0 %v2831_v22 }
 0x16b   :  { %811 = vmatprep.subr.mxu1 %v2984_v15  ;;  %1036 = vmatprep.subr.mxu0 %v2868_v39 }
 0x16c   :  { %2364 = vmatmul.mubr.msk.f32.vlgmr.msra.gmra.mxu0 %vm545_vm4, %v2899_v48  ;;  %812 = vmatpush1.msra.mxu1 %v2981_v14 }
 0x16d   :  { %1037 = vmatpush1.msra.mxu0 %v2865_v38  ;;  %813 = vmatprep.subr.mxu1 %v2846_v25 }
 0x16e   :  { %1038 = vmatprep.subr.mxu0 %v2872_v40  ;;  %814 = vmatpush1.msra.mxu1 %v2840_v24 }
 0x16f   :  { %1039 = vmatpush1.msra.mxu0 %v2876_v41  ;;  %776 = vmatprep.mubr.f32.mxu0 %v2716_v3 }
 0x170   :  { %2366 = vmatmul.mubr.msk.f32.vlgmr.msra.gmra.mxu1 %vm545_vm4, %v2899_v48  ;;  %1040 = vmatprep.subr.mxu0 %v2883_v45 }
 0x171   :  { %1113 = vmatprep.subr.mxu1 %v2886_v46  ;;  %2365 = vmatmul.mubr.msk.f32.gmra.mxu0 %vm545_vm4, %v2909_v51 }
 0x172   :  { %1041 = vmatpush1.msra.mxu0 %v2880_v44  ;;  %1114 = vmatpush1.msra.mxu1 %v2890_v47 }
 0x173   :  { %1042 = vmatprep.subr.mxu0 %v2822_v21  ;;  %1115 = vmatprep.subr.mxu1 %v2912_v54 }
 0x174   :  { %853 = vmatprep.mubr.f32.mxu1 %v2716_v3  ;;  %1043 = vmatpush1.msra.mxu0 %v2805_v18 }
 0x175   :  { %1116 = vmatpush1.msra.mxu1 %v2915_v55  ;;  %1076 = vmatprep.mubr.f32.mxu0 %v2716_v3 }
 0x176   :  { %2367 = vmatmul.mubr.msk.f32.gmra.mxu1 %vm545_vm4, %v2909_v51  ;;  %1117 = vmatprep.subr.mxu1 %v2921_v56 }
 0x177   :  { %1190 = vmatprep.subr.mxu0 %v2930_v60  ;;  %2384 = vmatmul.mubr.msk.f32.vlgmr.msra.gmra.mxu0 %vm545_vm4, %v972_v16 }
 0x178   :  { %1118 = vmatpush1.msra.mxu1 %v2926_v57  ;;  %1191 = vmatpush1.msra.mxu0 %v2934_v61 }
 0x179   :  { %1119 = vmatprep.subr.mxu1 %v2816_v20  ;;  %1192 = vmatprep.subr.mxu0 %v2953_v4 }
 0x17a   :  { %1120 = vmatpush1.msra.mxu1 %v2807_v19  ;;  %1153 = vmatprep.mubr.f32.mxu1 %v2716_v3 }
 0x17b   :  { %1193 = vmatpush1.msra.mxu0 %v2950_v2  ;;  %1082 = vmatprep.mubr.f32.mxu0 %v2716_v3 }
 0x17c   :  { %2386 = vmatmul.mubr.msk.f32.vlgmr.msra.gmra.mxu1 %vm545_vm4, %v972_v16  ;;  %1194 = vmatprep.subr.mxu0 %v2975_v11 }
 0x17d   :  { %1267 = vmatprep.subr.mxu1 %v2939_v62  ;;  %2385 = vmatmul.mubr.msk.f32.gmra.mxu0 %vm545_vm4, %v973_v17 }
 0x17e   :  { %1195 = vmatpush1.msra.mxu0 %v2972_v10  ;;  %1268 = vmatpush1.msra.mxu1 %v2944_v63 }
 0x17f   :  { %1196 = vmatprep.subr.mxu0 %v2838_v23  ;;  %1269 = vmatprep.subr.mxu1 %v2966_v7 }
 0x180   :  { %1159 = vmatprep.mubr.f32.mxu1 %v2716_v3  ;;  %1197 = vmatpush1.msra.mxu0 %v2831_v22 }
 0x181   :  { %1270 = vmatpush1.msra.mxu1 %v2962_v6  ;;  %1230 = vmatprep.mubr.f32.mxu0 %v2716_v3 }
 0x182   :  { %2387 = vmatmul.mubr.msk.f32.gmra.mxu1 %vm545_vm4, %v973_v17  ;;  %1271 = vmatprep.subr.mxu1 %v2984_v15 }
 0x183   :  { %1496 = vmatprep.subr.mxu0 %v2868_v39  ;;  %2388 = vmatmul.mubr.msk.f32.vlgmr.msra.gmra.mxu0 %vm545_vm4, %v972_v16 }
 0x184   :  { %1272 = vmatpush1.msra.mxu1 %v2981_v14  ;;  %1497 = vmatpush1.msra.mxu0 %v2865_v38 }
 0x185   :  { %1273 = vmatprep.subr.mxu1 %v2846_v25  ;;  %1498 = vmatprep.subr.mxu0 %v2872_v40 }
 0x186   :  { %1274 = vmatpush1.msra.mxu1 %v2840_v24  ;;  %1307 = vmatprep.mubr.f32.mxu1 %v2716_v3 }
 0x187   :  { %1499 = vmatpush1.msra.mxu0 %v2876_v41  ;;  %1236 = vmatprep.mubr.f32.mxu0 %v2716_v3 }
 0x188   :  { %2390 = vmatmul.mubr.msk.f32.vlgmr.msra.gmra.mxu1 %vm545_vm4, %v972_v16  ;;  %1500 = vmatprep.subr.mxu0 %v2883_v45 }
 0x189   :  { %1573 = vmatprep.subr.mxu1 %v2886_v46  ;;  %2389 = vmatmul.mubr.msk.f32.gmra.mxu0 %vm545_vm4, %v973_v17 }
 0x18a   :  { %1501 = vmatpush1.msra.mxu0 %v2880_v44  ;;  %1574 = vmatpush1.msra.mxu1 %v2890_v47 }
 0x18b   :  { %1502 = vmatprep.subr.mxu0 %v2822_v21  ;;  %1575 = vmatprep.subr.mxu1 %v2912_v54 }
 0x18c   :  { %1313 = vmatprep.mubr.f32.mxu1 %v2716_v3  ;;  %1503 = vmatpush1.msra.mxu0 %v2805_v18 }
 0x18d   :  { %1576 = vmatpush1.msra.mxu1 %v2915_v55  ;;  %1536 = vmatprep.mubr.f32.mxu0 %v2716_v3 }
 0x18e   :  { %2391 = vmatmul.mubr.msk.f32.gmra.mxu1 %vm545_vm4, %v973_v17  ;;  %1577 = vmatprep.subr.mxu1 %v2921_v56 }
 0x18f   :  { %1650 = vmatprep.subr.mxu0 %v2930_v60  ;;  %2408 = vmatmul.mubr.msk.f32.vlgmr.msra.gmra.mxu0 %vm545_vm4, %v1432_v26 }
 0x190   :  { %1578 = vmatpush1.msra.mxu1 %v2926_v57  ;;  %1651 = vmatpush1.msra.mxu0 %v2934_v61 }
 0x191   :  { %1579 = vmatprep.subr.mxu1 %v2816_v20  ;;  %1652 = vmatprep.subr.mxu0 %v2953_v4 }
 0x192   :  { %1580 = vmatpush1.msra.mxu1 %v2807_v19  ;;  %1613 = vmatprep.mubr.f32.mxu1 %v2716_v3 }
 0x193   :  { %1653 = vmatpush1.msra.mxu0 %v2950_v2  ;;  %1542 = vmatprep.mubr.f32.mxu0 %v2716_v3 }
 0x194   :  { %2410 = vmatmul.mubr.msk.f32.vlgmr.msra.gmra.mxu1 %vm545_vm4, %v1432_v26  ;;  %1654 = vmatprep.subr.mxu0 %v2975_v11 }
 0x195   :  { %1727 = vmatprep.subr.mxu1 %v2939_v62  ;;  %2409 = vmatmul.mubr.msk.f32.gmra.mxu0 %vm545_vm4, %v1433_v27 }
 0x196   :  { %1655 = vmatpush1.msra.mxu0 %v2972_v10  ;;  %1728 = vmatpush1.msra.mxu1 %v2944_v63 }
 0x197   :  { %1656 = vmatprep.subr.mxu0 %v2838_v23  ;;  %1729 = vmatprep.subr.mxu1 %v2966_v7 }
 0x198   :  { %1619 = vmatprep.mubr.f32.mxu1 %v2716_v3  ;;  %1657 = vmatpush1.msra.mxu0 %v2831_v22 }
 0x199   :  { %1730 = vmatpush1.msra.mxu1 %v2962_v6  ;;  %1690 = vmatprep.mubr.f32.mxu0 %v2716_v3 }
 0x19a   :  { %2411 = vmatmul.mubr.msk.f32.gmra.mxu1 %vm545_vm4, %v1433_v27  ;;  %1731 = vmatprep.subr.mxu1 %v2984_v15 }
 0x19b   :  { %1956 = vmatprep.subr.mxu0 %v2868_v39  ;;  %2412 = vmatmul.mubr.msk.f32.vlgmr.msra.gmra.mxu0 %vm545_vm4, %v1432_v26 }
 0x19c   :  { %1732 = vmatpush1.msra.mxu1 %v2981_v14  ;;  %1957 = vmatpush1.msra.mxu0 %v2865_v38 }
 0x19d   :  { %1733 = vmatprep.subr.mxu1 %v2846_v25  ;;  %1958 = vmatprep.subr.mxu0 %v2872_v40 }
 0x19e   :  { %1734 = vmatpush1.msra.mxu1 %v2840_v24  ;;  %1767 = vmatprep.mubr.f32.mxu1 %v2716_v3 }
 0x19f   :  { %1959 = vmatpush1.msra.mxu0 %v2876_v41  ;;  %1696 = vmatprep.mubr.f32.mxu0 %v2716_v3 }
 0x1a0   :  { %2414 = vmatmul.mubr.msk.f32.vlgmr.msra.gmra.mxu1 %vm545_vm4, %v1432_v26  ;;  %1960 = vmatprep.subr.mxu0 %v2883_v45 }
 0x1a1   :  { %2033 = vmatprep.subr.mxu1 %v2886_v46  ;;  %2413 = vmatmul.mubr.msk.f32.gmra.mxu0 %vm545_vm4, %v1433_v27 }
 0x1a2   :  { %1961 = vmatpush1.msra.mxu0 %v2880_v44  ;;  %2034 = vmatpush1.msra.mxu1 %v2890_v47 }
 0x1a3   :  { %1962 = vmatprep.subr.mxu0 %v2822_v21  ;;  %2035 = vmatprep.subr.mxu1 %v2912_v54 }
 0x1a4   :  { %1773 = vmatprep.mubr.f32.mxu1 %v2716_v3  ;;  %1963 = vmatpush1.msra.mxu0 %v2805_v18  ;;  %v1893_v18 = vld [vmem:[%s3357_s2 + $0x38] sm:$0xff] }
 0x1a5   :  { %2036 = vmatpush1.msra.mxu1 %v2915_v55  ;;  %1996 = vmatprep.mubr.f32.mxu0 %v2716_v3 }
 0x1a6   :  { %2415 = vmatmul.mubr.msk.f32.gmra.mxu1 %vm545_vm4, %v1433_v27  ;;  %2037 = vmatprep.subr.mxu1 %v2921_v56 }
 0x1a7   :  { %2110 = vmatprep.subr.mxu0 %v2930_v60  ;;  %2432 = vmatmul.mubr.msk.f32.vlgmr.msra.gmra.mxu0 %vm545_vm4, %v1892_v28 }
 0x1a8   :  { %2038 = vmatpush1.msra.mxu1 %v2926_v57  ;;  %2111 = vmatpush1.msra.mxu0 %v2934_v61 }
 0x1a9   :  { %2039 = vmatprep.subr.mxu1 %v2816_v20  ;;  %2112 = vmatprep.subr.mxu0 %v2953_v4 }
 0x1aa   :  { %2040 = vmatpush1.msra.mxu1 %v2807_v19  ;;  %2073 = vmatprep.mubr.f32.mxu1 %v2716_v3 }
 0x1ab   :  { %2113 = vmatpush1.msra.mxu0 %v2950_v2  ;;  %2434 = vmatmul.mubr.msk.f32.vlgmr.msra.gmra.mxu1 %vm545_vm4, %v1892_v28 }
 0x1ac   :  { %2114 = vmatprep.subr.mxu0 %v2975_v11  ;;  %2187 = vmatprep.subr.mxu1 %v2939_v62 }
 0x1ad   :  { %2115 = vmatpush1.msra.mxu0 %v2972_v10  ;;  %2188 = vmatpush1.msra.mxu1 %v2944_v63 }
 0x1ae   :  { %2002 = vmatprep.mubr.f32.mxu0 %v2716_v3  ;;  %2116 = vmatprep.subr.mxu0 %v2838_v23 }
 0x1af   :  { %2189 = vmatprep.subr.mxu1 %v2966_v7  ;;  %2433 = vmatmul.mubr.msk.f32.gmra.mxu0 %vm545_vm4, %v1893_v18 }
 0x1b0   :  { %2079 = vmatprep.mubr.f32.mxu1 %v2716_v3  ;;  %2117 = vmatpush1.msra.mxu0 %v2831_v22 }
 0x1b1   :  { %2190 = vmatpush1.msra.mxu1 %v2962_v6  ;;  %2150 = vmatprep.mubr.f32.mxu0 %v2716_v3 }
 0x1b2   :  { %2435 = vmatmul.mubr.msk.f32.gmra.mxu1 %vm545_vm4, %v1893_v18  ;;  %2191 = vmatprep.subr.mxu1 %v2984_v15 }
 0x1b3   :  { %2192 = vmatpush1.msra.mxu1 %v2981_v14  ;;  %2436 = vmatmul.mubr.msk.f32.vlgmr.msra.gmra.mxu0 %vm545_vm4, %v1892_v28 }
 0x1b4   :  { %2193 = vmatprep.subr.mxu1 %v2846_v25  ;;  %2227 = vmatprep.mubr.f32.mxu1 %v2716_v3 }
 0x1b5   :  { %2194 = vmatpush1.msra.mxu1 %v2840_v24  ;;  %2156 = vmatprep.mubr.f32.mxu0 %v2716_v3 }
 0x1b6   :  { %2438 = vmatmul.mubr.msk.f32.vlgmr.msra.gmra.mxu1 %vm545_vm4, %v1892_v28 }
 0x1b7   :  { %2437 = vmatmul.mubr.msk.f32.gmra.mxu0 %vm545_vm4, %v1893_v18  ;;  %2233 = vmatprep.mubr.f32.mxu1 %v2716_v3 }
 0x1ba   :  { %2439 = vmatmul.mubr.msk.f32.gmra.mxu1 %vm545_vm4, %v1893_v18 }
 0x213   :  { %v618_v19 = vpop.f32.mrf.mxu0 }
 0x214   :  { %v2368_v20 = vmul.f32 -1.442695, %v618_v19 }
 0x215   :  { %v620_v21 = vpop.f32.mrf.mxu0 }
 0x216   :  { %2460 = vpow2.f32 %v2368_v20  ;;  %v2369_v22 = vmul.f32 -1.442695, %v620_v21 }
 0x217   :  { %v624_v23 = vpop.f32.mrf.mxu0 }
 0x218   :  { %2462 = vpow2.f32 %v2369_v22  ;;  %v2376_v25 = vmul.f32 -1.442695, %v624_v23 }
 0x219   :  { %v626_v29 = vpop.f32.mrf.mxu0 }
 0x21a   :  { %2464 = vpow2.f32 %v2376_v25  ;;  %v2377_v24 = vmul.f32 -1.442695, %v626_v29 }
 0x21c   :  { %2466 = vpow2.f32 %v2377_v24 }
 0x21d   :  { %v695_v30 = vpop.f32.mrf.mxu1 }
 0x21e   :  { %v2370_v31 = vmul.f32 -1.442695, %v695_v30 }
 0x21f   :  { %v697_v32 = vpop.f32.mrf.mxu1 }
 0x220   :  { %2468 = vpow2.f32 %v2370_v31  ;;  %v2371_v33 = vmul.f32 -1.442695, %v697_v32 }
 0x221   :  { %v701_v3 = vpop.f32.mrf.mxu1 }
 0x222   :  { %2470 = vpow2.f32 %v2371_v33  ;;  %v2378_v34 = vmul.f32 -1.442695, %v701_v3 }
 0x223   :  { %v2461_v35 = vpop.eup %2460  ;;  %v703_v36 = vpop.f32.mrf.mxu1 }
 0x224   :  { %v908_v37 = vadd.f32 1.0, %v2461_v35  ;;  %2472 = vpow2.f32 %v2378_v34  ;;  %v2379_v38 = vmul.f32 -1.442695, %v703_v36 }
 0x225   :  { %v2463_v39 = vpop.eup %2462 }
 0x226   :  { %2474 = vrcp.f32 %v908_v37  ;;  %v909_v40 = vadd.f32 1.0, %v2463_v39 }
 0x227   :  { %v2465_v41 = vpop.eup %2464  ;;  %2476 = vpow2.f32 %v2379_v38 }
 0x228   :  { %2478 = vrcp.f32 %v909_v40  ;;  %v916_v42 = vadd.f32 1.0, %v2465_v41 }
 0x229   :  { %v2467_v43 = vpop.eup %2466 }
 0x22a   :  { %2480 = vrcp.f32 %v916_v42  ;;  %v917_v44 = vadd.f32 1.0, %v2467_v43 }
 0x22c   :  { %2482 = vrcp.f32 %v917_v44  ;;  %v772_v45 = vpop.f32.mrf.mxu0 }
 0x22d   :  { %v2469_v46 = vpop.eup %2468  ;;  %v2372_v47 = vmul.f32 -1.442695, %v772_v45 }
 0x22e   :  { %v910_v48 = vadd.f32 1.0, %v2469_v46  ;;  %v774_v49 = vpop.f32.mrf.mxu0 }
 0x22f   :  { %v2471_v50 = vpop.eup %2470  ;;  %2484 = vpow2.f32 %v2372_v47  ;;  %v2373_v51 = vmul.f32 -1.442695, %v774_v49 }
 0x230   :  { %2486 = vrcp.f32 %v910_v48  ;;  %v911_v52 = vadd.f32 1.0, %v2471_v50  ;;  %v849_v53 = vpop.f32.mrf.mxu1 }
 0x231   :  { %v2473_v54 = vpop.eup %2472  ;;  %v2374_v55 = vmul.f32 -1.442695, %v849_v53  ;;  %2488 = vpow2.f32 %v2373_v51  ;;  %v778_v56 = vpop.f32.mrf.mxu0 }
 0x232   :  { %2490 = vrcp.f32 %v911_v52  ;;  %v918_v57 = vadd.f32 1.0, %v2473_v54  ;;  %v851_v58 = vpop.f32.mrf.mxu1  ;;  %v2380_v59 = vmul.f32 -1.442695, %v778_v56 }
 0x233   :  { %v2475_v60 = vpop.eup %2474  ;;  %2492 = vpow2.f32 %v2374_v55  ;;  %v2375_v61 = vmul.f32 -1.442695, %v851_v58  ;;  %v780_v62 = vpop.f32.mrf.mxu0 }
 0x234   :  { %v2477_v63 = vpop.eup %2476  ;;  %956 = vst [vmem:[%s3358_s3] sm:$0xff] %v2475_v60  ;;  %2494 = vrcp.f32 %v918_v57  ;;  %v2381_v0 = vmul.f32 -1.442695, %v780_v62 }
 0x235   :  { %v2479_v1 = vpop.eup %2478  ;;  %v919_v2 = vadd.f32 1.0, %v2477_v63  ;;  %2496 = vpow2.f32 %v2375_v61 }
 0x236   :  { %957 = vst [vmem:[%s3358_s3 + $0x8] sm:$0xff] %v2479_v1  ;;  %2498 = vpow2.f32 %v2380_v59  ;;  %v855_v4 = vpop.f32.mrf.mxu1 }
 0x237   :  { %v2481_v5 = vpop.eup %2480  ;;  %2500 = vrcp.f32 %v919_v2  ;;  %v2382_v6 = vmul.f32 -1.442695, %v855_v4  ;;  %v1078_v7 = vpop.f32.mrf.mxu0 }
 0x238   :  { %964 = vst [vmem:[%s3358_s3 + $0x40] sm:$0xff] %v2481_v5  ;;  %2502 = vpow2.f32 %v2381_v0  ;;  %v857_v8 = vpop.f32.mrf.mxu1  ;;  %v2392_v9 = vmul.f32 -1.442695, %v1078_v7 }
 0x239   :  { %v2483_v10 = vpop.eup %2482  ;;  %2504 = vpow2.f32 %v2382_v6  ;;  %v2383_v11 = vmul.f32 -1.442695, %v857_v8  ;;  %v1080_v12 = vpop.f32.mrf.mxu0 }
 0x23a   :  { %965 = vst [vmem:[%s3358_s3 + $0x48] sm:$0xff] %v2483_v10  ;;  %2506 = vpow2.f32 %v2392_v9  ;;  %v2393_v13 = vmul.f32 -1.442695, %v1080_v12 }
 0x23b   :  { %2508 = vpow2.f32 %v2383_v11 }
 0x23c   :  { %v2485_v14 = vpop.eup %2484  ;;  %v1155_v15 = vpop.f32.mrf.mxu1  ;;  %2510 = vpow2.f32 %v2393_v13 }
 0x23d   :  { %v2487_v16 = vpop.eup %2486  ;;  %v912_v17 = vadd.f32 1.0, %v2485_v14  ;;  %v2394_v26 = vmul.f32 -1.442695, %v1155_v15  ;;  %v1084_v27 = vpop.f32.mrf.mxu0 }
 0x23e   :  { %v2489_v28 = vpop.eup %2488  ;;  %958 = vst [vmem:[%s3358_s3 + $0x10] sm:$0xff] %v2487_v16  ;;  %v1157_v18 = vpop.f32.mrf.mxu1  ;;  %v2400_v23 = vmul.f32 -1.442695, %v1084_v27 }
 0x23f   :  { %v2491_v19 = vpop.eup %2490  ;;  %2512 = vrcp.f32 %v912_v17  ;;  %v913_v20 = vadd.f32 1.0, %v2489_v28  ;;  %v2395_v21 = vmul.f32 -1.442695, %v1157_v18  ;;  %v1086_v24 = vpop.f32.mrf.mxu0 }
 0x240   :  { %v2493_v22 = vpop.eup %2492  ;;  %959 = vst [vmem:[%s3358_s3 + $0x18] sm:$0xff] %v2491_v19  ;;  %2514 = vpow2.f32 %v2394_v26  ;;  %v2401_v48 = vmul.f32 -1.442695, %v1086_v24 }
 0x241   :  { %v2495_v25 = vpop.eup %2494  ;;  %v914_v29 = vadd.f32 1.0, %v2493_v22  ;;  %2516 = vrcp.f32 %v913_v20 }
 0x242   :  { %v2497_v30 = vpop.eup %2496  ;;  %966 = vst [vmem:[%s3358_s3 + $0x50] sm:$0xff] %v2495_v25  ;;  %2518 = vpow2.f32 %v2395_v21  ;;  %v1161_v31 = vpop.f32.mrf.mxu1 }
 0x243   :  { %v2499_v32 = vpop.eup %2498  ;;  %2520 = vrcp.f32 %v914_v29  ;;  %v915_v33 = vadd.f32 1.0, %v2497_v30  ;;  %v2402_v3 = vmul.f32 -1.442695, %v1161_v31  ;;  %v1232_v38 = vpop.f32.mrf.mxu0 }
 0x244   :  { %v2501_v34 = vpop.eup %2500  ;;  %v920_v35 = vadd.f32 1.0, %v2499_v32  ;;  %2522 = vpow2.f32 %v2400_v23  ;;  %v1163_v36 = vpop.f32.mrf.mxu1  ;;  %v2396_v53 = vmul.f32 -1.442695, %v1232_v38 }
 0x245   :  { %v2503_v37 = vpop.eup %2502  ;;  %967 = vst [vmem:[%s3358_s3 + $0x58] sm:$0xff] %v2501_v34  ;;  %2524 = vrcp.f32 %v915_v33  ;;  %v1234_v49 = vpop.f32.mrf.mxu0  ;;  %v2403_v51 = vmul.f32 -1.442695, %v1163_v36 }
 0x246   :  { %v2505_v39 = vpop.eup %2504  ;;  %2526 = vrcp.f32 %v920_v35  ;;  %v921_v40 = vadd.f32 1.0, %v2503_v37  ;;  %v2397_v62 = vmul.f32 -1.442695, %v1234_v49 }
 0x247   :  { %v2507_v41 = vpop.eup %2506  ;;  %v922_v42 = vadd.f32 1.0, %v2505_v39  ;;  %2528 = vpow2.f32 %v2402_v3 }
 0x248   :  { %v2509_v43 = vpop.eup %2508  ;;  %2530 = vrcp.f32 %v921_v40  ;;  %v1368_v44 = vadd.f32 1.0, %v2507_v41  ;;  %v1309_v45 = vpop.f32.mrf.mxu1 }
 0x249   :  { %v2511_v46 = vpop.eup %2510  ;;  %2532 = vrcp.f32 %v922_v42  ;;  %v923_v47 = vadd.f32 1.0, %v2509_v43  ;;  %v2398_v56 = vmul.f32 -1.442695, %v1309_v45  ;;  %v1238_v57 = vpop.f32.mrf.mxu0 }
 0x24a   :  { %2534 = vrcp.f32 %v1368_v44  ;;  %v1369_v50 = vadd.f32 1.0, %v2511_v46  ;;  %v1311_v52 = vpop.f32.mrf.mxu1  ;;  %v2404_v8 = vmul.f32 -1.442695, %v1238_v57 }
 0x24b   :  { %2536 = vrcp.f32 %v923_v47  ;;  %v2399_v2 = vmul.f32 -1.442695, %v1311_v52  ;;  %v1240_v4 = vpop.f32.mrf.mxu0 }
 0x24c   :  { %v2513_v54 = vpop.eup %2512  ;;  %2538 = vrcp.f32 %v1369_v50  ;;  %v2405_v14 = vmul.f32 -1.442695, %v1240_v4 }
 0x24d   :  { %v2515_v55 = vpop.eup %2514  ;;  %960 = vst [vmem:[%s3358_s3 + $0x20] sm:$0xff] %v2513_v54  ;;  %2540 = vpow2.f32 %v2401_v48 }
 0x24e   :  { %v2517_v58 = vpop.eup %2516  ;;  %v1370_v59 = vadd.f32 1.0, %v2515_v55  ;;  %2542 = vpow2.f32 %v2403_v51  ;;  %v1315_v60 = vpop.f32.mrf.mxu1 }
 0x24f   :  { %v2519_v61 = vpop.eup %2518  ;;  %961 = vst [vmem:[%s3358_s3 + $0x28] sm:$0xff] %v2517_v58  ;;  %2544 = vpow2.f32 %v2396_v53  ;;  %v2406_v11 = vmul.f32 -1.442695, %v1315_v60  ;;  %v1538_v15 = vpop.f32.mrf.mxu0 }
 0x250   :  { %v2521_v63 = vpop.eup %2520  ;;  %2546 = vrcp.f32 %v1370_v59  ;;  %v1371_v0 = vadd.f32 1.0, %v2519_v61  ;;  %v1317_v5 = vpop.f32.mrf.mxu1  ;;  %v2416_v28 = vmul.f32 -1.442695, %v1538_v15 }
 0x251   :  { %v2523_v1 = vpop.eup %2522  ;;  %962 = vst [vmem:[%s3358_s3 + $0x30] sm:$0xff] %v2521_v63  ;;  %2548 = vpow2.f32 %v2398_v56  ;;  %v2407_v26 = vmul.f32 -1.442695, %v1317_v5  ;;  %v1540_v21 = vpop.f32.mrf.mxu0 }
 0x252   :  { %v2525_v6 = vpop.eup %2524  ;;  %2550 = vrcp.f32 %v1371_v0  ;;  %v1376_v7 = vadd.f32 1.0, %v2523_v1  ;;  %v2417_v31 = vmul.f32 -1.442695, %v1540_v21 }
 0x253   :  { %v2527_v9 = vpop.eup %2526  ;;  %963 = vst [vmem:[%s3358_s3 + $0x38] sm:$0xff] %v2525_v6  ;;  %2552 = vpow2.f32 %v2397_v62 }
 0x254   :  { %v2529_v10 = vpop.eup %2528  ;;  %968 = vst [vmem:[%s3358_s3 + $0x60] sm:$0xff] %v2527_v9  ;;  %2554 = vrcp.f32 %v1376_v7  ;;  %v1615_v16 = vpop.f32.mrf.mxu1 }
 0x255   :  { %v2531_v12 = vpop.eup %2530  ;;  %v1378_v13 = vadd.f32 1.0, %v2529_v10  ;;  %2556 = vpow2.f32 %v2399_v2  ;;  %v2418_v19 = vmul.f32 -1.442695, %v1615_v16  ;;  %v1544_v3 = vpop.f32.mrf.mxu0 }
 0x256   :  { %v2533_v17 = vpop.eup %2532  ;;  %969 = vst [vmem:[%s3358_s3 + $0x68] sm:$0xff] %v2531_v12  ;;  %2558 = vpow2.f32 %v2404_v8  ;;  %v1617_v22 = vpop.f32.mrf.mxu1  ;;  %v2424_v40 = vmul.f32 -1.442695, %v1544_v3 }
 0x257   :  { %v2535_v27 = vpop.eup %2534  ;;  %970 = vst [vmem:[%s3358_s3 + $0x70] sm:$0xff] %v2533_v17  ;;  %2560 = vrcp.f32 %v1378_v13  ;;  %v2419_v36 = vmul.f32 -1.442695, %v1617_v22  ;;  %v1546_v43 = vpop.f32.mrf.mxu0 }
 0x258   :  { %v2537_v18 = vpop.eup %2536  ;;  %1416 = vst [vmem:[%s3358_s3 + $0x80] sm:$0xff] %v2535_v27  ;;  %2562 = vpow2.f32 %v2406_v11  ;;  %v2425_v62 = vmul.f32 -1.442695, %v1546_v43 }
 0x259   :  { %v2539_v20 = vpop.eup %2538  ;;  %971 = vst [vmem:[%s3358_s3 + $0x78] sm:$0xff] %v2537_v18  ;;  %2564 = vpow2.f32 %v2405_v14 }
 0x25a   :  { %v2541_v23 = vpop.eup %2540  ;;  %1417 = vst [vmem:[%s3358_s3 + $0x88] sm:$0xff] %v2539_v20  ;;  %2566 = vpow2.f32 %v2407_v26  ;;  %v1621_v34 = vpop.f32.mrf.mxu1 }
 0x25b   :  { %v2543_v25 = vpop.eup %2542  ;;  %v1377_v29 = vadd.f32 1.0, %v2541_v23  ;;  %2568 = vpow2.f32 %v2416_v28  ;;  %v2426_v48 = vmul.f32 -1.442695, %v1621_v34  ;;  %v1692_v52 = vpop.f32.mrf.mxu0 }
 0x25c   :  { %v2545_v24 = vpop.eup %2544  ;;  %v1379_v30 = vadd.f32 1.0, %v2543_v25  ;;  %2570 = vpow2.f32 %v2418_v19  ;;  %v1623_v44 = vpop.f32.mrf.mxu1  ;;  %v2420_v6 = vmul.f32 -1.442695, %v1692_v52 }
 0x25d   :  { %v2547_v32 = vpop.eup %2546  ;;  %2572 = vrcp.f32 %v1377_v29  ;;  %v1372_v33 = vadd.f32 1.0, %v2545_v24  ;;  %v1694_v63 = vpop.f32.mrf.mxu0  ;;  %v2427_v4 = vmul.f32 -1.442695, %v1623_v44 }
 0x25e   :  { %v2549_v35 = vpop.eup %2548  ;;  %1418 = vst [vmem:[%s3358_s3 + $0x90] sm:$0xff] %v2547_v32  ;;  %2574 = vrcp.f32 %v1379_v30  ;;  %v2421_v15 = vmul.f32 -1.442695, %v1694_v63 }
 0x25f   :  { %v2551_v37 = vpop.eup %2550  ;;  %2576 = vrcp.f32 %v1372_v33  ;;  %v1374_v38 = vadd.f32 1.0, %v2549_v35 }
 0x260   :  { %v2553_v39 = vpop.eup %2552  ;;  %1419 = vst [vmem:[%s3358_s3 + $0x98] sm:$0xff] %v2551_v37  ;;  %2578 = vpow2.f32 %v2417_v31  ;;  %v1769_v53 = vpop.f32.mrf.mxu1 }
 0x261   :  { %v2555_v41 = vpop.eup %2554  ;;  %2580 = vrcp.f32 %v1374_v38  ;;  %v1373_v42 = vadd.f32 1.0, %v2553_v39  ;;  %v2422_v9 = vmul.f32 -1.442695, %v1769_v53  ;;  %v1698_v10 = vpop.f32.mrf.mxu0 }
 0x262   :  { %v2557_v45 = vpop.eup %2556  ;;  %1424 = vst [vmem:[%s3358_s3 + $0xc0] sm:$0xff] %v2555_v41  ;;  %2582 = vpow2.f32 %v2419_v36  ;;  %v1771_v0 = vpop.f32.mrf.mxu1  ;;  %v2428_v21 = vmul.f32 -1.442695, %v1698_v10 }
 0x263   :  { %v2559_v46 = vpop.eup %2558  ;;  %2584 = vrcp.f32 %v1373_v42  ;;  %v1375_v47 = vadd.f32 1.0, %v2557_v45  ;;  %v2423_v27 = vmul.f32 -1.442695, %v1771_v0  ;;  %v1700_v28 = vpop.f32.mrf.mxu0 }
 0x264   :  { %v2561_v49 = vpop.eup %2560  ;;  %v1380_v50 = vadd.f32 1.0, %v2559_v46  ;;  %2586 = vpow2.f32 %v2424_v40  ;;  %v2429_v30 = vmul.f32 -1.442695, %v1700_v28 }
 0x265   :  { %v2563_v51 = vpop.eup %2562  ;;  %1426 = vst [vmem:[%s3358_s3 + $0xd0] sm:$0xff] %v2561_v49  ;;  %2588 = vrcp.f32 %v1375_v47 }
 0x266   :  { %v2565_v54 = vpop.eup %2564  ;;  %2590 = vrcp.f32 %v1380_v50  ;;  %v1382_v55 = vadd.f32 1.0, %v2563_v51  ;;  %v1775_v11 = vpop.f32.mrf.mxu1 }
 0x267   :  { %v2567_v56 = vpop.eup %2566  ;;  %v1381_v57 = vadd.f32 1.0, %v2565_v54  ;;  %2592 = vpow2.f32 %v2426_v48  ;;  %v2430_v25 = vmul.f32 -1.442695, %v1775_v11  ;;  %v1998_v31 = vpop.f32.mrf.mxu0 }
 0x268   :  { %v2569_v58 = vpop.eup %2568  ;;  %2594 = vrcp.f32 %v1382_v55  ;;  %v1383_v59 = vadd.f32 1.0, %v2567_v56  ;;  %v1777_v18 = vpop.f32.mrf.mxu1  ;;  %v2440_v35 = vmul.f32 -1.442695, %v1998_v31 }
 0x269   :  { %v2571_v60 = vpop.eup %2570  ;;  %2596 = vrcp.f32 %v1381_v57  ;;  %v1828_v61 = vadd.f32 1.0, %v2569_v58  ;;  %v2431_v3 = vmul.f32 -1.442695, %v1777_v18  ;;  %v2000_v39 = vpop.f32.mrf.mxu0 }
 0x26a   :  { %v2573_v1 = vpop.eup %2572  ;;  %2598 = vrcp.f32 %v1383_v59  ;;  %v1830_v2 = vadd.f32 1.0, %v2571_v60  ;;  %v2441_v46 = vmul.f32 -1.442695, %v2000_v39 }
 0x26b   :  { %v2575_v5 = vpop.eup %2574  ;;  %1425 = vst [vmem:[%s3358_s3 + $0xc8] sm:$0xff] %v2573_v1  ;;  %2600 = vrcp.f32 %v1828_v61  ;;  %v2075_v32 = vpop.f32.mrf.mxu1 }
 0x26c   :  { %v2577_v7 = vpop.eup %2576  ;;  %1427 = vst [vmem:[%s3358_s3 + $0xd8] sm:$0xff] %v2575_v5  ;;  %2602 = vrcp.f32 %v1830_v2  ;;  %v2442_v37 = vmul.f32 -1.442695, %v2075_v32 }
 0x26d   :  { %v2579_v8 = vpop.eup %2578  ;;  %1420 = vst [vmem:[%s3358_s3 + $0xa0] sm:$0xff] %v2577_v7  ;;  %2604 = vpow2.f32 %v2425_v62  ;;  %v2077_v43 = vpop.f32.mrf.mxu1 }
 0x26e   :  { %v2581_v12 = vpop.eup %2580  ;;  %v1829_v13 = vadd.f32 1.0, %v2579_v8  ;;  %2606 = vpow2.f32 %v2427_v4  ;;  %v2443_v50 = vmul.f32 -1.442695, %v2077_v43 }
 0x26f   :  { %v2583_v14 = vpop.eup %2582  ;;  %1422 = vst [vmem:[%s3358_s3 + $0xb0] sm:$0xff] %v2581_v12  ;;  %2608 = vpow2.f32 %v2420_v6  ;;  %v2004_v51 = vpop.f32.mrf.mxu0 }
 0x270   :  { %v2585_v16 = vpop.eup %2584  ;;  %2610 = vrcp.f32 %v1829_v13  ;;  %v1831_v17 = vadd.f32 1.0, %v2583_v14  ;;  %v2448_v56 = vmul.f32 -1.442695, %v2004_v51 }
 0x271   :  { %v2587_v26 = vpop.eup %2586  ;;  %1421 = vst [vmem:[%s3358_s3 + $0xa8] sm:$0xff] %v2585_v16  ;;  %2612 = vpow2.f32 %v2422_v9  ;;  %v2006_v60 = vpop.f32.mrf.mxu0 }
 0x272   :  { %v2589_v19 = vpop.eup %2588  ;;  %2614 = vrcp.f32 %v1831_v17  ;;  %v1836_v20 = vadd.f32 1.0, %v2587_v26  ;;  %v2081_v54 = vpop.f32.mrf.mxu1 }
 0x273   :  { %v2591_v22 = vpop.eup %2590  ;;  %1423 = vst [vmem:[%s3358_s3 + $0xb8] sm:$0xff] %v2589_v19  ;;  %2616 = vpow2.f32 %v2421_v15  ;;  %v2450_v63 = vmul.f32 -1.442695, %v2081_v54  ;;  %v2152_v7 = vpop.f32.mrf.mxu0  ;;  %v2449_v15 = vmul.f32 -1.442695, %v2006_v60 }
 0x274   :  { %v2593_v23 = vpop.eup %2592  ;;  %1428 = vst [vmem:[%s3358_s3 + $0xe0] sm:$0xff] %v2591_v22  ;;  %2618 = vrcp.f32 %v1836_v20  ;;  %v2083_v0 = vpop.f32.mrf.mxu1  ;;  %v2444_v18 = vmul.f32 -1.442695, %v2152_v7 }
 0x275   :  { %v2595_v29 = vpop.eup %2594  ;;  %v1838_v24 = vadd.f32 1.0, %v2593_v23  ;;  %2620 = vpow2.f32 %v2423_v27  ;;  %v2451_v26 = vmul.f32 -1.442695, %v2083_v0  ;;  %v2154_v27 = vpop.f32.mrf.mxu0 }
 0x276   :  { %v2597_v33 = vpop.eup %2596  ;;  %1430 = vst [vmem:[%s3358_s3 + $0xf0] sm:$0xff] %v2595_v29  ;;  %2622 = vpow2.f32 %v2428_v21  ;;  %v2229_v10 = vpop.f32.mrf.mxu1 }
 0x277   :  { %v2599_v34 = vpop.eup %2598  ;;  %1429 = vst [vmem:[%s3358_s3 + $0xe8] sm:$0xff] %v2597_v33  ;;  %2624 = vrcp.f32 %v1838_v24  ;;  %v2446_v22 = vmul.f32 -1.442695, %v2229_v10  ;;  %v2158_v29 = vpop.f32.mrf.mxu0 }
 0x278   :  { %v2601_v36 = vpop.eup %2600  ;;  %1431 = vst [vmem:[%s3358_s3 + $0xf8] sm:$0xff] %v2599_v34  ;;  %2626 = vpow2.f32 %v2430_v25  ;;  %v2231_v19 = vpop.f32.mrf.mxu1 }
 0x279   :  { %v2603_v38 = vpop.eup %2602  ;;  %1876 = vst [vmem:[%s3358_s3 + $0x100] sm:$0xff] %v2601_v36  ;;  %2628 = vpow2.f32 %v2429_v30  ;;  %v2445_v30 = vmul.f32 -1.442695, %v2154_v27  ;;  %v2447_v34 = vmul.f32 -1.442695, %v2231_v19 }
 0x27a   :  { %v2605_v40 = vpop.eup %2604  ;;  %1878 = vst [vmem:[%s3358_s3 + $0x110] sm:$0xff] %v2603_v38  ;;  %2630 = vpow2.f32 %v2431_v3  ;;  %v2235_v31 = vpop.f32.mrf.mxu1 }
 0x27b   :  { %v2607_v41 = vpop.eup %2606  ;;  %v1837_v42 = vadd.f32 1.0, %v2605_v40  ;;  %2632 = vpow2.f32 %v2440_v35  ;;  %v2160_v38 = vpop.f32.mrf.mxu0 }
 0x27c   :  { %v2609_v44 = vpop.eup %2608  ;;  %v1839_v45 = vadd.f32 1.0, %v2607_v41  ;;  %2634 = vpow2.f32 %v2442_v37  ;;  %v2452_v37 = vmul.f32 -1.442695, %v2158_v29  ;;  %v2237_v40 = vpop.f32.mrf.mxu1 }
 0x27d   :  { %v2611_v47 = vpop.eup %2610  ;;  %2636 = vrcp.f32 %v1837_v42  ;;  %v1832_v48 = vadd.f32 1.0, %v2609_v44  ;;  %v2454_v42 = vmul.f32 -1.442695, %v2235_v31 }
 0x27e   :  { %v2613_v49 = vpop.eup %2612  ;;  %1877 = vst [vmem:[%s3358_s3 + $0x108] sm:$0xff] %v2611_v47  ;;  %2638 = vrcp.f32 %v1839_v45  ;;  %v2453_v45 = vmul.f32 -1.442695, %v2160_v38  ;;  %v2455_v47 = vmul.f32 -1.442695, %v2237_v40 }
 0x27f   :  { %v2615_v52 = vpop.eup %2614  ;;  %2640 = vrcp.f32 %v1832_v48  ;;  %v1834_v53 = vadd.f32 1.0, %v2613_v49 }
 0x280   :  { %v2617_v55 = vpop.eup %2616  ;;  %1879 = vst [vmem:[%s3358_s3 + $0x118] sm:$0xff] %v2615_v52  ;;  %2642 = vpow2.f32 %v2441_v46 }
 0x281   :  { %v2619_v57 = vpop.eup %2618  ;;  %2644 = vrcp.f32 %v1834_v53  ;;  %v1833_v58 = vadd.f32 1.0, %v2617_v55 }
 0x282   :  { %v2621_v59 = vpop.eup %2620  ;;  %1884 = vst [vmem:[%s3358_s3 + $0x140] sm:$0xff] %v2619_v57  ;;  %2646 = vpow2.f32 %v2443_v50 }
 0x283   :  { %v2623_v61 = vpop.eup %2622  ;;  %2648 = vrcp.f32 %v1833_v58  ;;  %v1835_v62 = vadd.f32 1.0, %v2621_v59 }
 0x284   :  { %v2625_v1 = vpop.eup %2624  ;;  %v1840_v2 = vadd.f32 1.0, %v2623_v61  ;;  %2650 = vpow2.f32 %v2448_v56 }
 0x285   :  { %v2627_v4 = vpop.eup %2626  ;;  %1886 = vst [vmem:[%s3358_s3 + $0x150] sm:$0xff] %v2625_v1  ;;  %2652 = vrcp.f32 %v1835_v62 }
 0x286   :  { %v2629_v5 = vpop.eup %2628  ;;  %2654 = vrcp.f32 %v1840_v2  ;;  %v1842_v6 = vadd.f32 1.0, %v2627_v4 }
 0x287   :  { %v2631_v8 = vpop.eup %2630  ;;  %v1841_v9 = vadd.f32 1.0, %v2629_v5  ;;  %2656 = vpow2.f32 %v2450_v63 }
 0x288   :  { %v2633_v11 = vpop.eup %2632  ;;  %2658 = vrcp.f32 %v1842_v6  ;;  %v1843_v12 = vadd.f32 1.0, %v2631_v8 }
 0x289   :  { %v2635_v13 = vpop.eup %2634  ;;  %2660 = vrcp.f32 %v1841_v9  ;;  %v2288_v14 = vadd.f32 1.0, %v2633_v11 }
 0x28a   :  { %v2637_v16 = vpop.eup %2636  ;;  %2662 = vrcp.f32 %v1843_v12  ;;  %v2290_v17 = vadd.f32 1.0, %v2635_v13 }
 0x28b   :  { %v2639_v28 = vpop.eup %2638  ;;  %1885 = vst [vmem:[%s3358_s3 + $0x148] sm:$0xff] %v2637_v16  ;;  %2664 = vrcp.f32 %v2288_v14 }
 0x28c   :  { %v2641_v20 = vpop.eup %2640  ;;  %1887 = vst [vmem:[%s3358_s3 + $0x158] sm:$0xff] %v2639_v28  ;;  %2666 = vrcp.f32 %v2290_v17 }
 0x28d   :  { %v2643_v21 = vpop.eup %2642  ;;  %1880 = vst [vmem:[%s3358_s3 + $0x120] sm:$0xff] %v2641_v20  ;;  %2668 = vpow2.f32 %v2449_v15 }
 0x28e   :  { %v2645_v23 = vpop.eup %2644  ;;  %v2289_v25 = vadd.f32 1.0, %v2643_v21  ;;  %2670 = vpow2.f32 %v2451_v26 }
 0x28f   :  { %v2647_v24 = vpop.eup %2646  ;;  %1882 = vst [vmem:[%s3358_s3 + $0x130] sm:$0xff] %v2645_v23  ;;  %2672 = vpow2.f32 %v2444_v18 }
 0x290   :  { %v2649_v32 = vpop.eup %2648  ;;  %2674 = vrcp.f32 %v2289_v25  ;;  %v2291_v33 = vadd.f32 1.0, %v2647_v24 }
 0x291   :  { %v2651_v3 = vpop.eup %2650  ;;  %1881 = vst [vmem:[%s3358_s3 + $0x128] sm:$0xff] %v2649_v32  ;;  %2676 = vpow2.f32 %v2446_v22 }
 0x292   :  { %v2653_v35 = vpop.eup %2652  ;;  %2678 = vrcp.f32 %v2291_v33  ;;  %v2296_v36 = vadd.f32 1.0, %v2651_v3 }
 0x293   :  { %v2655_v39 = vpop.eup %2654  ;;  %1883 = vst [vmem:[%s3358_s3 + $0x138] sm:$0xff] %v2653_v35  ;;  %2680 = vpow2.f32 %v2445_v30 }
 0x294   :  { %v2657_v41 = vpop.eup %2656  ;;  %1888 = vst [vmem:[%s3358_s3 + $0x160] sm:$0xff] %v2655_v39  ;;  %2682 = vrcp.f32 %v2296_v36 }
 0x295   :  { %v2659_v43 = vpop.eup %2658  ;;  %v2298_v44 = vadd.f32 1.0, %v2657_v41  ;;  %2684 = vpow2.f32 %v2447_v34 }
 0x296   :  { %v2661_v46 = vpop.eup %2660  ;;  %1890 = vst [vmem:[%s3358_s3 + $0x170] sm:$0xff] %v2659_v43  ;;  %2686 = vpow2.f32 %v2452_v37 }
 0x297   :  { %v2663_v48 = vpop.eup %2662  ;;  %1889 = vst [vmem:[%s3358_s3 + $0x168] sm:$0xff] %v2661_v46  ;;  %2688 = vrcp.f32 %v2298_v44 }
 0x298   :  { %v2665_v49 = vpop.eup %2664  ;;  %1891 = vst [vmem:[%s3358_s3 + $0x178] sm:$0xff] %v2663_v48  ;;  %2690 = vpow2.f32 %v2454_v42 }
 0x299   :  { %v2667_v50 = vpop.eup %2666  ;;  %2336 = vst [vmem:[%s3358_s3 + $0x180] sm:$0xff] %v2665_v49  ;;  %2692 = vpow2.f32 %v2453_v45 }
 0x29a   :  { %v2669_v51 = vpop.eup %2668  ;;  %2338 = vst [vmem:[%s3358_s3 + $0x190] sm:$0xff] %v2667_v50  ;;  %2694 = vpow2.f32 %v2455_v47 }
 0x29b   :  { %v2671_v52 = vpop.eup %2670  ;;  %v2297_v53 = vadd.f32 1.0, %v2669_v51 }
 0x29c   :  { %v2673_v54 = vpop.eup %2672  ;;  %v2299_v55 = vadd.f32 1.0, %v2671_v52 }
 0x29d   :  { %v2675_v56 = vpop.eup %2674  ;;  %2696 = vrcp.f32 %v2297_v53  ;;  %v2292_v57 = vadd.f32 1.0, %v2673_v54 }
 0x29e   :  { %v2677_v58 = vpop.eup %2676  ;;  %2337 = vst [vmem:[%s3358_s3 + $0x188] sm:$0xff] %v2675_v56  ;;  %2698 = vrcp.f32 %v2299_v55 }
 0x29f   :  { %v2679_v59 = vpop.eup %2678  ;;  %2700 = vrcp.f32 %v2292_v57  ;;  %v2294_v60 = vadd.f32 1.0, %v2677_v58 }
 0x2a0   :  { %v2681_v61 = vpop.eup %2680  ;;  %2339 = vst [vmem:[%s3358_s3 + $0x198] sm:$0xff] %v2679_v59 }
 0x2a1   :  { %v2683_v62 = vpop.eup %2682  ;;  %2702 = vrcp.f32 %v2294_v60  ;;  %v2293_v63 = vadd.f32 1.0, %v2681_v61 }
 0x2a2   :  { %v2685_v0 = vpop.eup %2684  ;;  %2344 = vst [vmem:[%s3358_s3 + $0x1c0] sm:$0xff] %v2683_v62 }
 0x2a3   :  { %v2687_v1 = vpop.eup %2686  ;;  %2704 = vrcp.f32 %v2293_v63  ;;  %v2295_v2 = vadd.f32 1.0, %v2685_v0 }
 0x2a4   :  { %v2689_v4 = vpop.eup %2688  ;;  %v2300_v5 = vadd.f32 1.0, %v2687_v1 }
 0x2a5   :  { %v2691_v6 = vpop.eup %2690  ;;  %2346 = vst [vmem:[%s3358_s3 + $0x1d0] sm:$0xff] %v2689_v4  ;;  %2706 = vrcp.f32 %v2295_v2 }
 0x2a6   :  { %v2693_v7 = vpop.eup %2692  ;;  %2708 = vrcp.f32 %v2300_v5  ;;  %v2302_v8 = vadd.f32 1.0, %v2691_v6 }
 0x2a7   :  { %v2695_v9 = vpop.eup %2694  ;;  %v2301_v10 = vadd.f32 1.0, %v2693_v7 }
 0x2a8   :  { %2710 = vrcp.f32 %v2302_v8  ;;  %v2303_v11 = vadd.f32 1.0, %v2695_v9 }
 0x2a9   :  { %2712 = vrcp.f32 %v2301_v10 }
 0x2aa   :  { %v2697_v12 = vpop.eup %2696  ;;  %2714 = vrcp.f32 %v2303_v11 }
 0x2ab   :  { %v2699_v13 = vpop.eup %2698  ;;  %2345 = vst [vmem:[%s3358_s3 + $0x1c8] sm:$0xff] %v2697_v12 }
 0x2ac   :  { %v2701_v14 = vpop.eup %2700  ;;  %2347 = vst [vmem:[%s3358_s3 + $0x1d8] sm:$0xff] %v2699_v13 }
 0x2ad   :  { %2340 = vst [vmem:[%s3358_s3 + $0x1a0] sm:$0xff] %v2701_v14 }
 0x2ae   :  { %v2703_v15 = vpop.eup %2702 }
 0x2af   :  { %2342 = vst [vmem:[%s3358_s3 + $0x1b0] sm:$0xff] %v2703_v15 }
 0x2b0   :  { %v2705_v16 = vpop.eup %2704 }
 0x2b1   :  { %2341 = vst [vmem:[%s3358_s3 + $0x1a8] sm:$0xff] %v2705_v16 }
 0x2b2   :  { %v2707_v17 = vpop.eup %2706 }
 0x2b3   :  { %v2709_v26 = vpop.eup %2708  ;;  %2343 = vst [vmem:[%s3358_s3 + $0x1b8] sm:$0xff] %v2707_v17 }
 0x2b4   :  { %2348 = vst [vmem:[%s3358_s3 + $0x1e0] sm:$0xff] %v2709_v26 }
 0x2b5   :  { %v2711_v27 = vpop.eup %2710 }
 0x2b6   :  { %v2713_v28 = vpop.eup %2712  ;;  %2350 = vst [vmem:[%s3358_s3 + $0x1f0] sm:$0xff] %v2711_v27 }
 0x2b7   :  { %v2715_v18 = vpop.eup %2714  ;;  %2349 = vst [vmem:[%s3358_s3 + $0x1e8] sm:$0xff] %v2713_v28 }
 0x2b8   :  { %2351 = vst [vmem:[%s3358_s3 + $0x1f8] sm:$0xff] %v2715_v18 }

</bundles_post_ra>
